<compile_context>
chip_gen: v7x
topology: tpu7x:2x2x1
jax: 0.10.0
libtpu: 0.0.40
codegen_flags: <defaults>
</compile_context>

<pallas_src>
import functools

import jax
import jax.numpy as jnp
from jax import lax
from jax.experimental import pallas as pl
from jax.experimental.pallas import tpu as pltpu

MATMUL_DTYPE = jnp.bfloat16            # MXU operand dtype (f32 accumulation)
_VMEM_LIMIT = 32 * 1024 * 1024


def _round_up(x, m):
    return ((x + m - 1) // m) * m


# --------------------------------------------------------------------------
# Kernel 1: pointwise conv (1x1) == row-tiled matmul + bias.
# --------------------------------------------------------------------------
def _linear_kernel(x_ref, w_ref, b_ref, o_ref):
    x = x_ref[...].astype(w_ref.dtype)
    o_ref[...] = (jnp.dot(x, w_ref[...], preferred_element_type=jnp.float32)
                  + b_ref[...]).astype(o_ref.dtype)


def linear(x, w, b, tile_m=512):
    M, Cin = x.shape
    Cout = w.shape[1]
    tm = min(tile_m, _round_up(M, 8))
    Mp = _round_up(M, tm)
    if Mp != M:
        x = jnp.pad(x, ((0, Mp - M), (0, 0)))
    out = pl.pallas_call(
        _linear_kernel,
        out_shape=jax.ShapeDtypeStruct((Mp, Cout), jnp.float32),
        grid=(Mp // tm,),
        in_specs=[pl.BlockSpec((tm, Cin), lambda i: (i, 0)),
                  pl.BlockSpec((Cin, Cout), lambda i: (0, 0)),
                  pl.BlockSpec((1, Cout), lambda i: (0, 0))],
        out_specs=pl.BlockSpec((tm, Cout), lambda i: (i, 0)),
        compiler_params=pltpu.CompilerParams(
            dimension_semantics=("parallel",),
            vmem_limit_bytes=_VMEM_LIMIT),
    )(x, w, b.reshape(1, Cout))
    return out[:M] if Mp != M else out


# --------------------------------------------------------------------------
# Kernel 2: fused GCNResidualLayer.
#   Per batch element:  pad x in VMEM -> learned adjacency (dilated conv +
#   channel softmax) -> cosine adjacency (pairwise cos + softmax over L) ->
#   supports (one matmul on the padded sequence) -> 2x graph conv + F.fold
#   (shift-add into padded scratch) + ReLU -> 1x1 conv -> residual + mask.
# --------------------------------------------------------------------------
def _gcn_layer_kernel(x_ref, m_ref, wadj_ref, badj_ref, wg1_ref, bg1_ref,
                      wg2_ref, bg2_ref, w1_ref, b1_ref, o_ref,
                      xpad_ref, fold1_ref, fold2_ref, *, K, dilation, pad):
    L = x_ref.shape[1]
    C = x_ref.shape[2]

    # ---- padded sequence in VMEM (replaces HBM-materialized unfold) -------
    xpad_ref[...] = jnp.zeros_like(xpad_ref)
    xpad_ref[pl.ds(pad, L), :] = x_ref[0]

    # K dilated taps: u[k][l, :] == x[l + k*dilation - pad, :] (0 outside).
    u = [xpad_ref[pl.ds(k * dilation, L), :] for k in range(K)]

    # ---- learned adjacency: conv (C -> K*K) folded into one matmul --------
    u_cat = jnp.concatenate(u, axis=-1).astype(wadj_ref.dtype)       # (L, K*C)
    logits = (jnp.dot(u_cat, wadj_ref[...],
                      preferred_element_type=jnp.float32) + badj_ref[...])
    logits = logits - jnp.max(logits, axis=-1, keepdims=True)        # over K*K
    e2 = jnp.exp(logits)
    adj2 = e2 * pl.reciprocal(jnp.sum(e2, axis=-1, keepdims=True), approx=True)

    # ---- cosine adjacency: pairwise cos over taps + softmax over L --------
    eps = 1e-8
    inv_n = [lax.rsqrt(jnp.maximum(jnp.sum(u[k] * u[k], axis=-1, keepdims=True),
                                   eps * eps)) for k in range(K)]
    uh = [u[k] * inv_n[k] for k in range(K)]
    cols = [None] * (K * K)
    for i in range(K):
        for j in range(i, K):
            c = jnp.sum(uh[i] * uh[j], axis=-1, keepdims=True)       # (L, 1)
            cols[i * K + j] = c
            if j != i:
                cols[j * K + i] = c                                  # symmetric
    cos = jnp.concatenate(cols, axis=-1)                             # (L, K*K)
    cos = cos - jnp.max(cos, axis=0, keepdims=True)                  # over L
    e1 = jnp.exp(cos)
    adj1 = e1 * pl.reciprocal(jnp.sum(e1, axis=0, keepdims=True), approx=True)

    # ---- supports: one matmul on the padded sequence covers all K taps ----
    xpad_mm = xpad_ref[...].astype(wg1_ref.dtype)                    # (Lp, C)
    sup1 = jnp.dot(xpad_mm, wg1_ref[...], preferred_element_type=jnp.float32)
    sup2 = jnp.dot(xpad_mm, wg2_ref[...], preferred_element_type=jnp.float32)
    sup1_t = [sup1[k * dilation:k * dilation + L, :] for k in range(K)]
    sup2_t = [sup2[k * dilation:k * dilation + L, :] for k in range(K)]

    # ---- graph conv + F.fold: accumulate into padded scratch + ReLU -------
    fold1_ref[...] = jnp.zeros_like(fold1_ref)
    fold2_ref[...] = jnp.zeros_like(fold2_ref)
    for i in range(K):
        acc1 = jnp.zeros((L, C), jnp.float32)
        acc2 = jnp.zeros((L, C), jnp.float32)
        for j in range(K):
            a1 = adj1[:, i * K + j:i * K + j + 1]                    # (L, 1)
            a2 = adj2[:, i * K + j:i * K + j + 1]
            acc1 = acc1 + a1 * sup1_t[j]
            acc2 = acc2 + a2 * sup2_t[j]
        acc1 = acc1 + bg1_ref[...]
        acc2 = acc2 + bg2_ref[...]
        off = i * dilation                                           # static
        fold1_ref[pl.ds(off, L), :] += acc1
        fold2_ref[pl.ds(off, L), :] += acc2
    s = (jnp.maximum(fold1_ref[pl.ds(pad, L), :], 0.0)
         + jnp.maximum(fold2_ref[pl.ds(pad, L), :], 0.0))

    # ---- 1x1 conv + residual + mask ----------------------------------------
    y = (jnp.dot(s.astype(w1_ref.dtype), w1_ref[...],
                 preferred_element_type=jnp.float32) + b1_ref[...])
    # TODO(synk): nn.Dropout layers treated as eval-mode identity (deterministic).
    o_ref[0] = ((x_ref[0] + y) * m_ref[0]).astype(o_ref.dtype)


def gcn_residual_layer(x, mask_l1, lp, dilation, K):
    B, L, C = x.shape
    pad = dilation * (K - 1) // 2
    Lp = L + 2 * pad
    K2 = K * K
    return pl.pallas_call(
        functools.partial(_gcn_layer_kernel, K=K, dilation=dilation, pad=pad),
        out_shape=jax.ShapeDtypeStruct((B, L, C), jnp.float32),
        grid=(B,),
        in_specs=[pl.BlockSpec((1, L, C), lambda b: (b, 0, 0)),
                  pl.BlockSpec((1, L, 1), lambda b: (b, 0, 0)),
                  pl.BlockSpec((K * C, K2), lambda b: (0, 0)),
                  pl.BlockSpec((1, K2), lambda b: (0, 0)),
                  pl.BlockSpec((C, C), lambda b: (0, 0)),
                  pl.BlockSpec((1, C), lambda b: (0, 0)),
                  pl.BlockSpec((C, C), lambda b: (0, 0)),
                  pl.BlockSpec((1, C), lambda b: (0, 0)),
                  pl.BlockSpec((C, C), lambda b: (0, 0)),
                  pl.BlockSpec((1, C), lambda b: (0, 0))],
        out_specs=pl.BlockSpec((1, L, C), lambda b: (b, 0, 0)),
        scratch_shapes=[pltpu.VMEM((Lp, C), jnp.float32),    # padded x
                        pltpu.VMEM((Lp, C), jnp.float32),    # fold acc (gcn1)
                        pltpu.VMEM((Lp, C), jnp.float32)],   # fold acc (gcn2)
        compiler_params=pltpu.CompilerParams(
            dimension_semantics=("parallel",),
            vmem_limit_bytes=_VMEM_LIMIT),
    )(x, mask_l1,
      lp["w_adj"], lp["b_adj"].reshape(1, K2),
      lp["w_g1"], lp["b_g1"].reshape(1, C),
      lp["w_g2"], lp["b_g2"].reshape(1, C),
      lp["w_1x1"], lp["b_1x1"].reshape(1, C))


# --------------------------------------------------------------------------
# Stage forward (transposes NCL <-> NLC only at the wrapper boundary).
# --------------------------------------------------------------------------
def gcn_stage_forward(params, x_ncl, mask_ncl, ex_x_ncl, ex_label):
    K = params["df_size"]
    x = jnp.transpose(x_ncl, (0, 2, 1)).astype(jnp.float32)          # (B, L, dim)
    ex_x = jnp.transpose(ex_x_ncl, (0, 2, 1)).astype(jnp.float32)
    m = jnp.transpose(mask_ncl[:, 0:1, :], (0, 2, 1)).astype(jnp.float32)  # (B,L,1)

    def pointwise(t, w, b):
        Bt, Lt, Ct = t.shape
        return linear(t.reshape(Bt * Lt, Ct), w, b).reshape(Bt, Lt, -1)

    def trunk(inp):
        out = pointwise(inp, params["w_in"], params["b_in"])
        for i, lp in enumerate(params["layers"]):
            out = gcn_residual_layer(out, m, lp, 2 ** i, K)
        return out

    out = trunk(x)
    pred = pointwise(out, params["w_out"], params["b_out"]) * m
    ex_out = trunk(ex_x)
    ex_pred = pointwise(ex_out, params["w_ex"], params["b_ex"]) * m
    ex_clspred = pointwise(ex_out, params["w_out"], params["b_out"]) * m
    to_ncl = lambda t: jnp.transpose(t, (0, 2, 1))
    return to_ncl(pred), to_ncl(ex_pred), ex_label, to_ncl(ex_clspred)


# --------------------------------------------------------------------------
# Deterministic parameter init (shapes follow the PyTorch __init__).
# Matmul weights stored pre-transposed (channels-last) in bf16; biases f32.
# Conv1d adjacency weight stored flattened as (K*Cin, K*K): row k*Cin+c <->
# torch weight[:, c, k].
# --------------------------------------------------------------------------
def init_params(key, num_layers, num_f_maps, df_size, dim, num_classes):
    K = df_size
    mm = MATMUL_DTYPE

    def u(k, shape, scale, dtype=jnp.float32):
        return jax.random.uniform(k, shape, jnp.float32, -scale, scale).astype(dtype)

    keys = jax.random.split(key, 8 + num_layers)
    s_in = 1.0 / (dim ** 0.5)
    s_f = 1.0 / (num_f_maps ** 0.5)
    s_adj = 1.0 / ((num_f_maps * K) ** 0.5)
    params = {
        "df_size": K,
        "w_in": u(keys[0], (dim, num_f_maps), s_in, mm),
        "b_in": u(keys[1], (num_f_maps,), s_in),
        "w_out": u(keys[2], (num_f_maps, num_classes), s_f, mm),
        "b_out": u(keys[3], (num_classes,), s_f),
        "w_ex": u(keys[4], (num_f_maps, 2), s_f, mm),
        "b_ex": u(keys[5], (2,), s_f),
        "layers": [],
    }
    for i in range(num_layers):
        lk = jax.random.split(keys[8 + i], 8)
        lp = {
            "w_g1": u(lk[0], (num_f_maps, num_f_maps), s_f, mm),
            "b_g1": u(lk[1], (num_f_maps,), s_f),
            "w_g2": u(lk[2], (num_f_maps, num_f_maps), s_f, mm),
            "b_g2": u(lk[3], (num_f_maps,), s_f),
            "w_adj": u(lk[4], (K * num_f_maps, K * K), s_adj, mm),
            "b_adj": u(lk[5], (K * K,), s_adj),
            "w_1x1": u(lk[6], (num_f_maps, num_f_maps), s_f, mm),
            "b_1x1": u(lk[7], (num_f_maps,), s_f),
        }
        params["layers"].append(lp)
    return params


if __name__ == "__main__":
    B, L = 2, 16
    dim, num_f_maps, df_size, num_layers, num_classes = 4, 8, 3, 2, 5

    key = jax.random.PRNGKey(0)
    k_p, k_x, k_ex, k_lab = jax.random.split(key, 4)
    params = init_params(k_p, num_layers, num_f_maps, df_size, dim, num_classes)

    x = jax.random.normal(k_x, (B, dim, L), jnp.float32)
    ex_x = jax.random.normal(k_ex, (B, dim, L), jnp.float32)
    mask = jnp.ones((B, 1, L), jnp.float32)
    mask = mask.at[1, :, L - 4:].set(0.0)          # ragged second sequence
    ex_label = jax.random.randint(k_lab, (B, L), 0, num_classes)

    pred, ex_pred, ex_lab_out, ex_clspred = gcn_stage_forward(
        params, x, mask, ex_x, ex_label)
    jax.block_until_ready((pred, ex_pred, ex_lab_out, ex_clspred))

    assert pred.shape == (B, num_classes, L)
    assert ex_pred.shape == (B, 2, L)
    assert ex_clspred.shape == (B, num_classes, L)
    assert ex_lab_out.shape == (B, L)
    assert bool(jnp.all(jnp.isfinite(pred)))
    assert bool(jnp.all(jnp.isfinite(ex_pred)))
    assert bool(jnp.all(jnp.isfinite(ex_clspred)))
    print("KERNEL_OK")
</pallas_src>

<mosaic_0001>
module attributes {stable_mosaic.version = 11 : i64} {
  func.func @_linear_kernel(%arg0: i32, %arg1: memref<32x4xf32, #tpu.memory_space<vmem>>, %arg2: memref<4x8xbf16, #tpu.memory_space<vmem>>, %arg3: memref<1x8xf32, #tpu.memory_space<vmem>>, %arg4: memref<32x8xf32, #tpu.memory_space<vmem>>) attributes {dimension_semantics = [#tpu.dimension_semantics<parallel>], iteration_bounds = array<i64: 1>, scalar_prefetch = 0 : i64, scratch_operands = 0 : i64, tpu.core_type = #tpu.core_type<tc>, window_params = [{transform_indices = @transform_0, window_bounds = array<i64: 32, 4>}, {pipeline_mode = #tpu.pipeline_mode<synchronous>, transform_indices = @transform_1, window_bounds = array<i64: 4, 8>}, {pipeline_mode = #tpu.pipeline_mode<synchronous>, transform_indices = @transform_2, window_bounds = array<i64: 1, 8>}, {transform_indices = @transform_3, window_bounds = array<i64: 32, 8>}]} {
    %c0 = arith.constant 0 : index
    %c0_0 = arith.constant 0 : index
    %0 = vector.load %arg1[%c0, %c0_0] : memref<32x4xf32, #tpu.memory_space<vmem>>, vector<32x4xf32>
    %1 = arith.truncf %0 : vector<32x4xf32> to vector<32x4xbf16>
    %c0_1 = arith.constant 0 : index
    %c0_2 = arith.constant 0 : index
    %2 = vector.load %arg2[%c0_1, %c0_2] : memref<4x8xbf16, #tpu.memory_space<vmem>>, vector<4x8xbf16>
    %cst = arith.constant dense<0.000000e+00> : vector<32x8xf32>
    %3 = tpu.matmul %1, %2, %cst {dimension_numbers = #tpu.dot_dimension_numbers<[1], [0], [0], [1], [0, 0, 1, 1], [], []>} : vector<32x4xbf16>, vector<4x8xbf16>, vector<32x8xf32> -> vector<32x8xf32>
    %c0_3 = arith.constant 0 : index
    %c0_4 = arith.constant 0 : index
    %4 = vector.load %arg3[%c0_3, %c0_4] : memref<1x8xf32, #tpu.memory_space<vmem>>, vector<1x8xf32>
    %5 = vector.broadcast %4 : vector<1x8xf32> to vector<32x8xf32>
    %6 = arith.addf %3, %5 : vector<32x8xf32>
    %c0_5 = arith.constant 0 : index
    %c0_6 = arith.constant 0 : index
    %7 = vector.load %arg4[%c0_5, %c0_6] : memref<32x8xf32, #tpu.memory_space<vmem>>, vector<32x8xf32>
    tpu.vector_store %arg4[%c0_5, %c0_6], %6 {strides = array<i32>} : memref<32x8xf32, #tpu.memory_space<vmem>>, vector<32x8xf32>,
    return
  }
  func.func @transform_0(%arg0: i32) -> (i32, i32) {
    %c0_i32 = arith.constant 0 : i32
    %c0_i32_0 = arith.constant 0 : i32
    return %arg0, %c0_i32 : i32, i32
  }
  func.func @transform_1(%arg0: i32) -> (i32, i32) {
    %c0_i32 = arith.constant 0 : i32
    %c0_i32_0 = arith.constant 0 : i32
    %c0_i32_1 = arith.constant 0 : i32
    return %c0_i32, %c0_i32_0 : i32, i32
  }
  func.func @transform_2(%arg0: i32) -> (i32, i32) {
    %c0_i32 = arith.constant 0 : i32
    %c0_i32_0 = arith.constant 0 : i32
    %c0_i32_1 = arith.constant 0 : i32
    return %c0_i32, %c0_i32_0 : i32, i32
  }
  func.func @transform_3(%arg0: i32) -> (i32, i32) {
    %c0_i32 = arith.constant 0 : i32
    %c0_i32_0 = arith.constant 0 : i32
    return %arg0, %c0_i32 : i32, i32
  }
}

</mosaic_0001>

<bundles_post_ra>
// kernel: tpu_custom_call.1
= control target key start
LH: loop header
LB: loop body
LE: loop exit
PB: predicated region body
PF: predicated region fallthrough
CT: control target
= control target key end

     0   :  { %vm36_vm0 = vcmask 1041408   ;;  %vm29_vm1 = vcmask 31744   ;;  %vm89_vm2 = vcmask 64512   ;;  %s161_s1 = inlined_call_operand.vmem [shape: bf16[4,8], index: 1, kind: input, shape index: {}]   ;;  %s162_s0 = inlined_call_operand.vmem [shape: f32[32,4], index: 0, kind: input, shape index: {}]   ;;  %s163_s2 = inlined_call_operand.vmem [shape: f32[1,8], index: 2, kind: input, shape index: {}]   ;;  %s164_s3 = inlined_call_operand.vmem [shape: f32[32,8], index: 3, kind: output, shape index: {}]  }
   0x1   :  { %v21_v0 = vld [vmem:[%s161_s1] sm:$0x3]  ;;  %v16_v2 = vld [vmem:[%s162_s0 + $0x8] sm:$0xff]  ;;  %v17_v5 = vld [vmem:[%s162_s0 + $0x10] sm:$0xff] }
   0x2   :  { %v15_v1 = vld [vmem:[%s162_s0] sm:$0xff]  ;;  %110 = vmatprep.subr.msk.bf16.mxu0 %vm36_vm0, %v21_v0  ;;  %v38_v3 = vsel %vm36_vm0, %v21_v0, 0  ;;  %v18_v6 = vld [vmem:[%s162_s0 + $0x18] sm:$0xff] }
   0x3   :  { %v19_v4 = vpack.c.bf16 %v16_v2, %v15_v1  ;;  %105 = vmatpush3.bf16.msra.mxu0 %v38_v3  ;;  %v20_v7 = vpack.c.bf16 %v18_v6, %v17_v5  ;;  %v98_v8 = vld [vmem:[%s163_s2] ss:$0 sm:$0xff] }
   0x5   :  { %106 = vmatprep.mubr.msk.bf16.mxu0 %vm29_vm1, %v19_v4 }
   0x6   :  { %107 = vmatmul.mubr.msk.bf16.vlgmr.msra.gmra.mrb[0].mxu0 %vm29_vm1, %v20_v7 }
  0xd9   :  { %v108_v9 = vpop.f32.mrb[0].mxu0 }
  0xda   :  { %v83_v10 = vadd.f32 %v108_v9, %v98_v8  ;;  %v74_v11 = vpop.f32.mrb[1].mxu0 }
  0xdb   :  { %v75_v12 = vadd.f32 %v98_v8, %v74_v11  ;;  %v109_v13 = vpop.f32.mrb[2].mxu0 }
  0xdc   :  { %92 = vst.msk [vmem:[%s164_s3 + $0x10] sm:$0xff] %vm89_vm2, %v83_v10  ;;  %v86_v14 = vadd.f32 %v109_v13, %v98_v8  ;;  %v77_v15 = vpop.f32.mrb[3].mxu0 }
  0xdd   :  { %90 = vst.msk [vmem:[%s164_s3] sm:$0xff] %vm89_vm2, %v75_v12  ;;  %v78_v16 = vadd.f32 %v98_v8, %v77_v15 }
  0xde   :  { %93 = vst.msk [vmem:[%s164_s3 + $0x18] sm:$0xff] %vm89_vm2, %v86_v14 }
  0xdf   :  { %91 = vst.msk [vmem:[%s164_s3 + $0x8] sm:$0xff] %vm89_vm2, %v78_v16 }

</bundles_post_ra>
